<compile_context>
chip_gen: v7x
topology: tpu7x:2x2x1
jax: 0.10.0
libtpu: 0.0.40
codegen_flags: <defaults>
</compile_context>

<pallas_src>
import functools

import jax
import jax.numpy as jnp
from jax.experimental import pallas as pl
from jax.experimental.pallas import tpu as pltpu


def _round_up(x, m):
    return (x + m - 1) // m * m


def fwm_fused_kernel(q_size, z_ref, wf_ref, bf_ref, f_ref, out_ref):
    """One batch tile.

    z_ref  : (TB, H)        input
    wf_ref : (H, Qp)        fused weights: [:, :Q]=W_q, [:, Q]=W_m, rest 0
    bf_ref : (1, Qp)        fused bias
    f_ref  : (TB, Qp, Vp)   fast weights, transposed to (q, v), zero padded
    out_ref: (TB, Vp)       output (lane-dense in V)
    """
    z = z_ref[...]                                                    # (TB, H)

    # Single fused projection on the MXU: columns [0:Q) -> q head, col Q -> m.
    fused = jnp.dot(z, wf_ref[...], preferred_element_type=jnp.float32)
    fused = fused + bf_ref[...]                                       # (TB, Qp)

    lane = jax.lax.broadcasted_iota(jnp.int32, fused.shape, 1)

    # qs = elu(x, 1) + 1  ==  where(x > 0, x + 1, exp(x)); zero the pad lanes
    # (incl. the m column) so the normalization sum is exact.
    qs = jnp.where(fused > 0.0, fused + 1.0, jnp.exp(fused))
    qs = jnp.where(lane < q_size, qs, 0.0)
    qs = qs * pl.reciprocal(jnp.sum(qs, axis=-1, keepdims=True))      # (TB, Qp)

    # ms = sigmoid of the fused m column.
    ms = jax.nn.sigmoid(fused[:, q_size:q_size + 1])                  # (TB, 1)

    w = ms * qs                                                       # (TB, Qp)

    # out[b, v] = sum_q F_t[b, q, v] * w[b, q]  -> lane-dense in V.
    f = f_ref[...]                                                    # (TB, Qp, Vp)
    out = jnp.einsum('bxq,bqv->bxv', w[:, None, :], f,
                     preferred_element_type=jnp.float32)[:, 0, :]     # (TB, Vp)
    out_ref[...] = out.astype(out_ref.dtype)


def fwm_forward(z, wq, bq, wm, bm, F):
    """Forward pass of FWM. Shapes: z (B,H), wq (H,Q), bq (1,Q), wm (H,1),
    bm (1,1), F (B,V,Q). Returns (B,V)."""
    B, H = z.shape
    Q = wq.shape[1]
    V = F.shape[1]

    Qp = _round_up(Q + 1, 128)          # +1 lane group slot for the m column
    Vp = _round_up(V, 128)
    TB = 128 if B >= 128 else 8         # batch tile: >= sublane height
    Bp = _round_up(B, TB)

    f32 = jnp.float32
    # Fused projection weights/bias: [W_q | W_m | 0], [b_q | b_m | 0].
    w_fused = jnp.zeros((H, Qp), f32).at[:, :Q].set(wq).at[:, Q:Q + 1].set(wm)
    b_fused = jnp.zeros((1, Qp), f32).at[:, :Q].set(bq).at[:, Q:Q + 1].set(bm)

    # Pad batch; transpose F to (B, Q, V) and zero-pad to (Bp, Qp, Vp).
    z_p = jnp.zeros((Bp, H), f32).at[:B].set(z)
    f_t = jnp.transpose(F, (0, 2, 1))
    f_p = jnp.zeros((Bp, Qp, Vp), f32).at[:B, :Q, :V].set(f_t)

    grid = (Bp // TB,)
    out_p = pl.pallas_call(
        functools.partial(fwm_fused_kernel, Q),
        out_shape=jax.ShapeDtypeStruct((Bp, Vp), f32),
        grid=grid,
        in_specs=[
            pl.BlockSpec((TB, H), lambda i: (i, 0)),        # z tile
            pl.BlockSpec((H, Qp), lambda i: (0, 0)),        # fused W (resident)
            pl.BlockSpec((1, Qp), lambda i: (0, 0)),        # fused b (resident)
            pl.BlockSpec((TB, Qp, Vp), lambda i: (i, 0, 0)),  # F tile
        ],
        out_specs=pl.BlockSpec((TB, Vp), lambda i: (i, 0)),
        compiler_params=pltpu.CompilerParams(
            dimension_semantics=("parallel",)),
    )(z_p, w_fused, b_fused, f_p)

    return out_p[:B, :V]


def reference_forward(z, wq, bq, wm, bm, F):
    q_lin = z @ wq + bq
    qs = jnp.where(q_lin > 0.0, q_lin + 1.0, jnp.exp(q_lin))
    qs = qs / jnp.sum(qs, axis=-1, keepdims=True)
    ms = jax.nn.sigmoid(z @ wm + bm)
    return jnp.einsum('bij,bj->bi', F, ms * qs)


if __name__ == "__main__":
    # Small, forward-consistent shapes.
    B, hidden_size, q_size, v_size = 2, 32, 16, 16

    key = jax.random.PRNGKey(0)
    kz, kf, kwq, kbq, kwm, kbm = jax.random.split(key, 6)

    def xavier_normal(k, fan_in, fan_out):
        std = (2.0 / (fan_in + fan_out)) ** 0.5
        return std * jax.random.normal(k, (fan_in, fan_out), jnp.float32)

    z = jax.random.normal(kz, (B, hidden_size), jnp.float32)
    F = 0.1 * jax.random.normal(kf, (B, v_size, q_size), jnp.float32)

    Wq = xavier_normal(kwq, hidden_size, q_size)     # (H, Q) = W_q.weight.T
    bq = 0.05 * jax.random.normal(kbq, (1, q_size), jnp.float32)
    Wm = xavier_normal(kwm, hidden_size, 1)          # (H, 1) = W_m.weight.T
    bm = 0.05 * jax.random.normal(kbm, (1, 1), jnp.float32)

    out = fwm_forward(z, Wq, bq, Wm, bm, F)
    out = jax.block_until_ready(out)

    ref = reference_forward(z, Wq, bq, Wm, bm, F)
    assert out.shape == (B, v_size)
    assert jnp.allclose(out, ref, atol=1e-5, rtol=1e-5), "mismatch vs JAX reference"

    print("KERNEL_OK")
</pallas_src>

<mosaic_0001>
module attributes {stable_mosaic.version = 11 : i64} {
  func.func @fwm_fused_kernel(%arg0: i32, %arg1: memref<8x32xf32, #tpu.memory_space<vmem>>, %arg2: memref<32x128xf32, #tpu.memory_space<vmem>>, %arg3: memref<1x128xf32, #tpu.memory_space<vmem>>, %arg4: memref<8x128x128xf32, #tpu.memory_space<vmem>>, %arg5: memref<8x128xf32, #tpu.memory_space<vmem>>) attributes {dimension_semantics = [#tpu.dimension_semantics<parallel>], iteration_bounds = array<i64: 1>, scalar_prefetch = 0 : i64, scratch_operands = 0 : i64, tpu.core_type = #tpu.core_type<tc>, window_params = [{transform_indices = @transform_0, window_bounds = array<i64: 8, 32>}, {pipeline_mode = #tpu.pipeline_mode<synchronous>, transform_indices = @transform_1, window_bounds = array<i64: 32, 128>}, {pipeline_mode = #tpu.pipeline_mode<synchronous>, transform_indices = @transform_2, window_bounds = array<i64: 1, 128>}, {transform_indices = @transform_3, window_bounds = array<i64: 8, 128, 128>}, {transform_indices = @transform_4, window_bounds = array<i64: 8, 128>}]} {
    %c0 = arith.constant 0 : index
    %c0_0 = arith.constant 0 : index
    %0 = vector.load %arg1[%c0, %c0_0] : memref<8x32xf32, #tpu.memory_space<vmem>>, vector<8x32xf32>
    %c0_1 = arith.constant 0 : index
    %c0_2 = arith.constant 0 : index
    %1 = vector.load %arg2[%c0_1, %c0_2] : memref<32x128xf32, #tpu.memory_space<vmem>>, vector<32x128xf32>
    %cst = arith.constant dense<0.000000e+00> : vector<8x128xf32>
    %2 = tpu.matmul %0, %1, %cst {dimension_numbers = #tpu.dot_dimension_numbers<[1], [0], [0], [1], [0, 0, 1, 1], [], []>} : vector<8x32xf32>, vector<32x128xf32>, vector<8x128xf32> -> vector<8x128xf32>
    %c0_3 = arith.constant 0 : index
    %c0_4 = arith.constant 0 : index
    %3 = vector.load %arg3[%c0_3, %c0_4] : memref<1x128xf32, #tpu.memory_space<vmem>>, vector<1x128xf32>
    %4 = vector.broadcast %3 : vector<1x128xf32> to vector<8x128xf32>
    %5 = arith.addf %2, %4 : vector<8x128xf32>
    %6 = tpu.iota {dimensions = array<i32: 1>} : vector<8x128xi32>
    %cst_5 = arith.constant 0.000000e+00 : f32
    %7 = vector.broadcast %cst_5 : f32 to vector<8x128xf32>
    %8 = arith.cmpf ogt, %5, %7 : vector<8x128xf32>
    %cst_6 = arith.constant 1.000000e+00 : f32
    %9 = vector.broadcast %cst_6 : f32 to vector<8x128xf32>
    %10 = arith.addf %5, %9 : vector<8x128xf32>
    %11 = math.exp %5 : vector<8x128xf32>
    %12 = arith.select %8, %10, %11 : vector<8x128xi1>, vector<8x128xf32>
    %c16_i32 = arith.constant 16 : i32
    %13 = vector.broadcast %c16_i32 : i32 to vector<8x128xi32>
    %14 = arith.cmpi slt, %6, %13 : vector<8x128xi32>
    %cst_7 = arith.constant 0.000000e+00 : f32
    %15 = vector.broadcast %cst_7 : f32 to vector<8x128xf32>
    %16 = arith.select %14, %12, %15 : vector<8x128xi1>, vector<8x128xf32>
    %cst_8 = arith.constant dense<0.000000e+00> : vector<8xf32>
    %17 = vector.multi_reduction <add>, %16, %cst_8 [1] : vector<8x128xf32> to vector<8xf32>
    %18 = vector.shape_cast %17 : vector<8xf32> to vector<8x1xf32>
    %19 = tpu.reciprocal %18 : vector<8x1xf32> -> vector<8x1xf32>
    %20 = vector.broadcast %19 : vector<8x1xf32> to vector<8x128xf32>
    %21 = arith.mulf %16, %20 : vector<8x128xf32>
    %22 = vector.extract_strided_slice %5 {offsets = [0, 16], sizes = [8, 1], strides = [1, 1]} : vector<8x128xf32> to vector<8x1xf32>
    %23 = arith.negf %22 : vector<8x1xf32>
    %24 = math.exp %23 : vector<8x1xf32>
    %cst_9 = arith.constant 1.000000e+00 : f32
    %25 = vector.broadcast %cst_9 : f32 to vector<8x1xf32>
    %26 = arith.addf %25, %24 : vector<8x1xf32>
    %27 = arith.divf %25, %26 : vector<8x1xf32>
    %28 = vector.broadcast %27 : vector<8x1xf32> to vector<8x128xf32>
    %29 = arith.mulf %28, %21 : vector<8x128xf32>
    %c0_10 = arith.constant 0 : index
    %c0_11 = arith.constant 0 : index
    %c0_12 = arith.constant 0 : index
    %30 = vector.load %arg4[%c0_10, %c0_11, %c0_12] : memref<8x128x128xf32, #tpu.memory_space<vmem>>, vector<8x128x128xf32>
    %31 = vector.shape_cast %29 : vector<8x128xf32> to vector<8x1x128xf32>
    "tpu.trace_start"() <{level = 10 : i32, message = "bxq,bqv->bxv"}> : () -> ()
    %cst_13 = arith.constant dense<0.000000e+00> : vector<8x1x128xf32>
    %32 = tpu.matmul %31, %30, %cst_13 {dimension_numbers = #tpu.dot_dimension_numbers<[2], [1], [1], [2], [0, 0, 0, 1, 1, 2], [0], [0]>} : vector<8x1x128xf32>, vector<8x128x128xf32>, vector<8x1x128xf32> -> vector<8x1x128xf32>
    "tpu.trace_stop"() : () -> ()
    %33 = vector.shape_cast %32 : vector<8x1x128xf32> to vector<8x128xf32>
    %c0_14 = arith.constant 0 : index
    %c0_15 = arith.constant 0 : index
    %34 = vector.load %arg5[%c0_14, %c0_15] : memref<8x128xf32, #tpu.memory_space<vmem>>, vector<8x128xf32>
    tpu.vector_store %arg5[%c0_14, %c0_15], %33 {strides = array<i32>} : memref<8x128xf32, #tpu.memory_space<vmem>>, vector<8x128xf32>,
    return
  }
  func.func @transform_0(%arg0: i32) -> (i32, i32) {
    %c0_i32 = arith.constant 0 : i32
    %c0_i32_0 = arith.constant 0 : i32
    return %arg0, %c0_i32 : i32, i32
  }
  func.func @transform_1(%arg0: i32) -> (i32, i32) {
    %c0_i32 = arith.constant 0 : i32
    %c0_i32_0 = arith.constant 0 : i32
    %c0_i32_1 = arith.constant 0 : i32
    return %c0_i32, %c0_i32_0 : i32, i32
  }
  func.func @transform_2(%arg0: i32) -> (i32, i32) {
    %c0_i32 = arith.constant 0 : i32
    %c0_i32_0 = arith.constant 0 : i32
    %c0_i32_1 = arith.constant 0 : i32
    return %c0_i32, %c0_i32_0 : i32, i32
  }
  func.func @transform_3(%arg0: i32) -> (i32, i32, i32) {
    %c0_i32 = arith.constant 0 : i32
    %c0_i32_0 = arith.constant 0 : i32
    %c0_i32_1 = arith.constant 0 : i32
    return %arg0, %c0_i32, %c0_i32_0 : i32, i32, i32
  }
  func.func @transform_4(%arg0: i32) -> (i32, i32) {
    %c0_i32 = arith.constant 0 : i32
    %c0_i32_0 = arith.constant 0 : i32
    return %arg0, %c0_i32 : i32, i32
  }
}

</mosaic_0001>

<bundles_post_ra>
// kernel: tpu_custom_call.1
= control target key start
LH: loop header
LB: loop body
LE: loop exit
PB: predicated region body
PF: predicated region fallthrough
CT: control target
= control target key end

     0   :  { %9 = vsyncpa [#allocation3], 0  ;;  %s1920_s0 = inlined_call_operand.hbm [shape: f32[8,32], index: 0, kind: input, shape index: {}]   ;;  %s1921_s1 = inlined_call_operand.hbm [shape: f32[32,128], index: 1, kind: input, shape index: {}]   ;;  %s1922_s2 = inlined_call_operand.vmem [shape: f32[1,128], index: 2, kind: input, shape index: {}]   ;;  %s1923_s3 = inlined_call_operand.hbm [shape: f32[8,128,128], index: 3, kind: input, shape index: {}]   ;;  %s1924_s4 = inlined_call_operand.hbm [shape: f32[8,128], index: 4, kind: output, shape index: {}]  }
   0x1   :  { %10 = vsyncpa [#allocation6], 0 }
   0x2   :  { %11 = vsyncpa [#allocation4], 0  ;;  %s1708_s15 = smov [#allocation5]   ;;  %s1614_s19 = scalar_lea.hbm %s1921_s1, 512 }
   0x3   :  { %s27_s16 = sshll.u32 %s1708_s15, 4  ;;  %p1615_p0 = scmp.ne.s32.totalorder %s1921_s1, %s1614_s19  ;;  %s28_s16 = int_to_ptr.vmem [resolvable:$true] %s27_s16 }
   0x4   :  { %p1618_p1 = scmp.lt.u32.totalorder %s1614_s19, %s1921_s1 }
   0x6   :  { %p1620_p2 = pnand %p1618_p1, %p1615_p0 }
   0x8   :  { %1623 = shalt.err (!%p1620_p2)
}
   0x9   :  { %s1624_s24 = scalar_lea.vmem %s28_s16, 512  ;;  %p1629_p4 = scmp.lt.s32.totalorder %s28_s16, %s28_s16 }
   0xa   :  { %p1625_p3 = scmp.ne.s32.totalorder %s28_s16, %s1624_s24  ;;  %p1630_p5 = scmp.lt.s32.totalorder %s1624_s24, %s1624_s24 }
   0xc   :  { %p1631_p6 = por %p1630_p5, %p1629_p4 }
   0xe   :  { %p1632_p7 = pnand %p1631_p6, %p1625_p3 }
  0x10   :  { %1635 = shalt.err (!%p1632_p7)
}
  0x11   :  { %s1709_s25 = smov 128   ;;  %s1710_s26 = smov 8  }
  0x12   :  { %33 = dma.hbm_to_vmem [thread:$0]  %s1921_s1, 512, %s28_s16, [#allocation6], %s1709_s25, %s1709_s25, %s1710_s26  }
  0x13   :  { %s1711_s29 = smov [#allocation2]   ;;  %s1712_s5 = smov [#allocation7]  }
  0x14   :  { %s18_s30 = sshll.u32 %s1711_s29, 4  ;;  %s41_s6 = sshll.u32 %s1712_s5, 4  ;;  %s19_s30 = int_to_ptr.vmem [resolvable:$true] %s18_s30  ;;  %s42_s6 = int_to_ptr.vmem [resolvable:$true] %s41_s6 }
  0x15   :  { %s1636_s9 = scalar_lea.hbm %s1920_s0, 128 }
  0x16   :  { %p1637_p8 = scmp.ne.s32.totalorder %s1920_s0, %s1636_s9  ;;  %p1640_p9 = scmp.lt.u32.totalorder %s1636_s9, %s1920_s0 }
  0x18   :  { %p1642_p10 = pnand %p1640_p9, %p1637_p8 }
  0x1a   :  { %1645 = shalt.err (!%p1642_p10)
}
  0x1b   :  { %s1646_s1 = scalar_lea.vmem %s19_s30, 128  ;;  %p1651_p12 = scmp.lt.s32.totalorder %s19_s30, %s19_s30 }
  0x1c   :  { %p1647_p11 = scmp.ne.s32.totalorder %s19_s30, %s1646_s1  ;;  %p1652_p13 = scmp.lt.s32.totalorder %s1646_s1, %s1646_s1 }
  0x1e   :  { %p1653_p0 = por %p1652_p13, %p1651_p12 }
  0x20   :  { %p1654_p1 = pnand %p1653_p0, %p1647_p11 }
  0x22   :  { %1657 = shalt.err (!%p1654_p1)
}
  0x23   :  { %21 = dma.hbm_to_vmem [thread:$0]  %s1920_s0, 128, %s19_s30, [#allocation3]  }
  0x24   :  { %s1658_s18 = scalar_lea.hbm %s1923_s3, 16384 }
  0x25   :  { %p1659_p2 = scmp.ne.s32.totalorder %s1923_s3, %s1658_s18  ;;  %p1662_p3 = scmp.lt.u32.totalorder %s1658_s18, %s1923_s3 }
  0x27   :  { %p1664_p4 = pnand %p1662_p3, %p1659_p2 }
  0x29   :  { %1667 = shalt.err (!%p1664_p4)
}
  0x2a   :  { %s1668_s23 = scalar_lea.vmem %s42_s6, 16384  ;;  %p1673_p6 = scmp.lt.s32.totalorder %s42_s6, %s42_s6 }
  0x2b   :  { %p1669_p5 = scmp.ne.s32.totalorder %s42_s6, %s1668_s23  ;;  %p1674_p7 = scmp.lt.s32.totalorder %s1668_s23, %s1668_s23 }
  0x2d   :  { %p1675_p8 = por %p1674_p7, %p1673_p6 }
  0x2f   :  { %p1676_p9 = pnand %p1675_p8, %p1669_p5 }
  0x31   :  { %1679 = shalt.err (!%p1676_p9)
}
  0x32   :  { %47 = dma.hbm_to_vmem [thread:$0]  %s1923_s3, 16384, %s42_s6, [#allocation6], %s1709_s25, %s1709_s25, %s1710_s26  }
  0x33   :  { %1702 = dma.done.wait [#allocation3], 128  }
  0x34   :  { %1703 = vsyncadd [#allocation3], 4294967168 }
  0x35   :  { %1704 = dma.done.wait [#allocation6], 16896  }
  0x36   :  { %1705 = vsyncadd [#allocation6], 4294950400  ;;  %v1713_v0 = vmov 0.0|0.0   ;;  %vm1714_vm0 = vmmov 0   ;;  %v1715_v1 = vmov 0.0   ;;  %v58_v2 = vld [vmem:[#allocation5] sm:$0xff]  ;;  %v143_v36 = vlaneseq }
  0x37   :  { %1396 = vmatprep.subr.bf16.mxu0 %v1713_v0  ;;  %1113 = vmatprep.mubr.msk.f32.mxu0 %vm1714_vm0, %v1715_v1  ;;  %v59_v3 = vld [vmem:[#allocation5 + $0x8] sm:$0xff]  ;;  %v60_v4 = vld [vmem:[#allocation5 + $0x10] sm:$0xff]  ;;  %v61_v6 = vld [vmem:[#allocation5 + $0x18] sm:$0xff]  ;;  %vm69_vm1 = vcmask 261120   ;;  %v1716_v9 = vmov 16   ;;  %vm923_vm4 = vcmask 1041409  }
  0x38   :  { %1402 = vmatprep.subr.bf16.mxu1 %v1713_v0  ;;  %1148 = vmatprep.mubr.msk.f32.mxu1 %vm1714_vm0, %v1715_v1  ;;  %v1397_v5 = vpack.c.bf16 %v59_v3, %v58_v2  ;;  %v1400_v7 = vpack.c.bf16 %v61_v6, %v60_v4  ;;  %v57_v8 = vld [vmem:[#allocation2] sm:$0xff]  ;;  %v168_v10 = vld [vmem:[#allocation7] sm:$0xff]  ;;  %v169_v11 = vld [vmem:[#allocation7 + $0x8] sm:$0xff]  ;;  %v144_v38 = vand.u32 127, %v143_v36  ;;  %vm926_vm5 = vcmask 1042434  }
  0x39   :  { %1605 = vset.pattern.permute.xlu0 %v1716_v9  ;;  %v184_v12 = vld [vmem:[#allocation7 + $0x80] sm:$0xff]  ;;  %v1403_v13 = vpack.c.bf16 %v169_v11, %v168_v10  ;;  %v185_v14 = vld [vmem:[#allocation7 + $0x88] sm:$0xff]  ;;  %v170_v15 = vld [vmem:[#allocation7 + $0x10] sm:$0xff]  ;;  %vm929_vm6 = vcmask 1043459   ;;  %vm932_vm7 = vcmask 1044484   ;;  %vm935_vm8 = vcmask 1045509  }
  0x3a   :  { %1398 = vmatpush3.bf16.msra.mxu0 %v1397_v5  ;;  %v171_v16 = vld [vmem:[#allocation7 + $0x18] sm:$0xff]  ;;  %v1427_v17 = vpack.c.bf16 %v185_v14, %v184_v12  ;;  %v186_v18 = vld [vmem:[#allocation7 + $0x90] sm:$0xff]  ;;  %v172_v22 = vld [vmem:[#allocation7 + $0x20] sm:$0xff]  ;;  %vm150_vm2 = vcmp.lt.s32.totalorder %v144_v38, 16  ;;  %v1717_v12 = vmov 1966171168  }
  0x3b   :  { %1399 = vmatprep.subr.bf16.mxu0 %v1713_v0  ;;  %v187_v19 = vld [vmem:[#allocation7 + $0x98] sm:$0xff]  ;;  %1404 = vmatpush3.bf16.msra.mxu1 %v1403_v13  ;;  %v1406_v20 = vpack.c.bf16 %v171_v16, %v170_v15  ;;  %v173_v23 = vld [vmem:[#allocation7 + $0x28] sm:$0xff]  ;;  %v188_v24 = vld [vmem:[#allocation7 + $0xa0] sm:$0xff]  ;;  %v299_v13 = vunpack.c.l.s4 %v1717_v12  ;;  %v302_v15 = vshrl.u32 %v143_v36, 7  ;;  %vm938_vm9 = vcmask 1046534  }
  0x3c   :  { %1405 = vmatprep.subr.bf16.mxu1 %v1713_v0  ;;  %v1430_v21 = vpack.c.bf16 %v187_v19, %v186_v18  ;;  %v189_v25 = vld [vmem:[#allocation7 + $0xa8] sm:$0xff]  ;;  %v1409_v26 = vpack.c.bf16 %v173_v23, %v172_v22  ;;  %v174_v28 = vld [vmem:[#allocation7 + $0x30] sm:$0xff]  ;;  %v175_v29 = vld [vmem:[#allocation7 + $0x38] sm:$0xff]  ;;  %vm941_vm10 = vcmask 1047559  }
  0x3d   :  { %v1433_v27 = vpack.c.bf16 %v189_v25, %v188_v24  ;;  %v1412_v30 = vpack.c.bf16 %v175_v29, %v174_v28  ;;  %v961_v31 = vld [vmem:[%s1922_s2] ss:$0 sm:$0xff]  ;;  %v190_v45 = vld [vmem:[#allocation7 + $0xb0] sm:$0xff]  ;;  %v176_v48 = vld [vmem:[#allocation7 + $0x40] sm:$0xff]  ;;  %v300_v14 = vunpack.c.0.s8 %v299_v13  ;;  %s1718_s2 = smov [#allocation8]  }
  0x3e   :  { %1401 = vmatpush3.bf16.msra.mxu0 %v1400_v7  ;;  %v191_v46 = vld [vmem:[#allocation7 + $0xb8] sm:$0xff]  ;;  %v177_v49 = vld [vmem:[#allocation7 + $0x48] sm:$0xff]  ;;  %v192_v50 = vld [vmem:[#allocation7 + $0xc0] sm:$0xff]  ;;  %s951_s26 = sshll.u32 %s1718_s2, 4  ;;  %s952_s26 = int_to_ptr.vmem [resolvable:$true] %s951_s26 }
  0x3f   :  { %1426 = vmatprep.subr.bf16.mxu0 %v1713_v0  ;;  %1407 = vmatpush3.bf16.msra.mxu1 %v1406_v20  ;;  %v1436_v47 = vpack.c.bf16 %v191_v46, %v190_v45  ;;  %v1415_v51 = vpack.c.bf16 %v177_v49, %v176_v48  ;;  %v193_v52 = vld [vmem:[#allocation7 + $0xc8] sm:$0xff]  ;;  %v178_v53 = vld [vmem:[#allocation7 + $0x50] sm:$0xff]  ;;  %v179_v54 = vld [vmem:[#allocation7 + $0x58] sm:$0xff]  ;;  %s1680_s27 = scalar_lea.vmem %s952_s26, 128  ;;  %p1685_p11 = scmp.lt.s32.totalorder %s952_s26, %s952_s26 }
  0x40   :  { %1408 = vmatprep.subr.bf16.mxu1 %v1713_v0  ;;  %v1439_v55 = vpack.c.bf16 %v193_v52, %v192_v50  ;;  %v1418_v56 = vpack.c.bf16 %v179_v54, %v178_v53  ;;  %v194_v58 = vld [vmem:[#allocation7 + $0xd0] sm:$0xff]  ;;  %v195_v59 = vld [vmem:[#allocation7 + $0xd8] sm:$0xff]  ;;  %v180_v61 = vld [vmem:[#allocation7 + $0x60] sm:$0xff]  ;;  %p1681_p10 = scmp.ne.s32.totalorder %s952_s26, %s1680_s27  ;;  %p1686_p12 = scmp.lt.s32.totalorder %s1680_s27, %s1680_s27 }
  0x41   :  { %1114 = vmatmul.mubr.msk.f32.vlgmr.msra.gmra.mrb[0].mxu0 %vm69_vm1, %v57_v8  ;;  %v1442_v60 = vpack.c.bf16 %v195_v59, %v194_v58  ;;  %v181_v62 = vld [vmem:[#allocation7 + $0x68] sm:$0xff]  ;;  %v196_v2 = vld [vmem:[#allocation7 + $0xe0] sm:$0xff]  ;;  %v182_v5 = vld [vmem:[#allocation7 + $0x70] sm:$0xff] }
  0x42   :  { %1183 = vmatprep.mubr.msk.f32.mxu0 %vm1714_vm0, %v1715_v1  ;;  %1428 = vmatpush3.bf16.msra.mxu0 %v1427_v17  ;;  %v1421_v63 = vpack.c.bf16 %v181_v62, %v180_v61  ;;  %v197_v3 = vld [vmem:[#allocation7 + $0xe8] sm:$0xff]  ;;  %v183_v6 = vld [vmem:[#allocation7 + $0x78] sm:$0xff]  ;;  %v198_v8 = vld [vmem:[#allocation7 + $0xf0] sm:$0xff]  ;;  %v1817_v17 = vsub.s32 %v300_v14, %v302_v15  ;;  %p1687_p13 = por %p1686_p12, %p1685_p11 }
  0x43   :  { %1429 = vmatprep.subr.bf16.mxu0 %v1713_v0  ;;  %1410 = vmatpush3.bf16.msra.mxu1 %v1409_v26  ;;  %v1445_v4 = vpack.c.bf16 %v197_v3, %v196_v2  ;;  %v1424_v7 = vpack.c.bf16 %v183_v6, %v182_v5  ;;  %v199_v9 = vld [vmem:[#allocation7 + $0xf8] sm:$0xff]  ;;  %v201_v22 = vld [vmem:[#allocation7 + $0x108] sm:$0xff]  ;;  %v216_v24 = vld [vmem:[#allocation7 + $0x180] sm:$0xff] }
  0x44   :  { %1411 = vmatprep.subr.bf16.mxu1 %v1713_v0  ;;  %v1448_v10 = vpack.c.bf16 %v199_v9, %v198_v8  ;;  %v217_v25 = vld [vmem:[#allocation7 + $0x188] sm:$0xff]  ;;  %v202_v29 = vld [vmem:[#allocation7 + $0x110] sm:$0xff]  ;;  %v204_v36 = vld [vmem:[#allocation7 + $0x120] sm:$0xff]  ;;  %p1688_p0 = pnand %p1687_p13, %p1681_p10 }
  0x45   :  { %v222_v45 = vld [vmem:[#allocation7 + $0x1b0] sm:$0xff]  ;;  %v223_v46 = vld [vmem:[#allocation7 + $0x1b8] sm:$0xff]  ;;  %v208_v48 = vld [vmem:[#allocation7 + $0x140] sm:$0xff] }
  0x46   :  { %1431 = vmatpush3.bf16.msra.mxu0 %v1430_v21  ;;  %v200_v21 = vld [vmem:[#allocation7 + $0x100] sm:$0xff]  ;;  %v209_v49 = vld [vmem:[#allocation7 + $0x148] sm:$0xff]  ;;  %v1484_v50 = vpack.c.bf16 %v223_v46, %v222_v45  ;;  %v210_v54 = vld [vmem:[#allocation7 + $0x150] sm:$0xff] }
  0x47   :  { %1432 = vmatprep.subr.bf16.mxu0 %v1713_v0  ;;  %1413 = vmatpush3.bf16.msra.mxu1 %v1412_v30  ;;  %v1451_v26 = vpack.c.bf16 %v201_v22, %v200_v21  ;;  %v203_v30 = vld [vmem:[#allocation7 + $0x118] sm:$0xff]  ;;  %v225_v52 = vld [vmem:[#allocation7 + $0x1c8] sm:$0xff]  ;;  %v1463_v53 = vpack.c.bf16 %v209_v49, %v208_v48  ;;  %v248_v13 = vld [vmem:[#allocation7 + $0x280] sm:$0xff] }
  0x48   :  { %1414 = vmatprep.subr.bf16.mxu1 %v1713_v0  ;;  %v227_v58 = vld [vmem:[#allocation7 + $0x1d8] sm:$0xff]  ;;  %v213_v61 = vld [vmem:[#allocation7 + $0x168] sm:$0xff] }
  0x49   :  { %v229_v2 = vld [vmem:[#allocation7 + $0x1e8] sm:$0xff]  ;;  %v215_v5 = vld [vmem:[#allocation7 + $0x178] sm:$0xff] }
  0x4a   :  { %1434 = vmatpush3.bf16.msra.mxu0 %v1433_v27  ;;  %v231_v8 = vld [vmem:[#allocation7 + $0x1f8] sm:$0xff]  ;;  %v249_v14 = vld [vmem:[#allocation7 + $0x288] sm:$0xff] }
  0x4b   :  { %1435 = vmatprep.subr.bf16.mxu0 %v1713_v0  ;;  %1416 = vmatpush3.bf16.msra.mxu1 %v1415_v51  ;;  %v224_v51 = vld [vmem:[#allocation7 + $0x1c0] sm:$0xff]  ;;  %v1523_v21 = vpack.c.bf16 %v249_v14, %v248_v13  ;;  %v243_v45 = vld [vmem:[#allocation7 + $0x258] sm:$0xff]  ;;  %v282_v13 = vld [vmem:[#allocation7 + $0x390] sm:$0xff] }
  0x4c   :  { %1417 = vmatprep.subr.bf16.mxu1 %v1713_v0  ;;  %v259_v48 = vld [vmem:[#allocation7 + $0x2d8] sm:$0xff] }
  0x4d   :  { %v283_v14 = vld [vmem:[#allocation7 + $0x398] sm:$0xff] }
  0x4e   :  { %1437 = vmatpush3.bf16.msra.mxu0 %v1436_v47 }
  0x4f   :  { %1438 = vmatprep.subr.bf16.mxu0 %v1713_v0  ;;  %1419 = vmatpush3.bf16.msra.mxu1 %v1418_v56  ;;  %v1487_v56 = vpack.c.bf16 %v225_v52, %v224_v51  ;;  %v245_v51 = vld [vmem:[#allocation7 + $0x268] sm:$0xff] }
  0x50   :  { %1420 = vmatprep.subr.bf16.mxu1 %v1713_v0 }
  0x52   :  { %1440 = vmatpush3.bf16.msra.mxu0 %v1439_v55  ;;  %v211_v55 = vld [vmem:[#allocation7 + $0x158] sm:$0xff] }
  0x53   :  { %1441 = vmatprep.subr.bf16.mxu0 %v1713_v0  ;;  %1422 = vmatpush3.bf16.msra.mxu1 %v1421_v63  ;;  %v1466_v59 = vpack.c.bf16 %v211_v55, %v210_v54  ;;  %v228_v63 = vld [vmem:[#allocation7 + $0x1e0] sm:$0xff]  ;;  %v261_v55 = vld [vmem:[#allocation7 + $0x2e8] sm:$0xff] }
  0x54   :  { %1423 = vmatprep.subr.bf16.mxu1 %v1713_v0  ;;  %v1493_v6 = vpack.c.bf16 %v229_v2, %v228_v63  ;;  %v260_v54 = vld [vmem:[#allocation7 + $0x2e0] sm:$0xff]  ;;  %v265_v2 = vld [vmem:[#allocation7 + $0x308] sm:$0xff] }
  0x55   :  { %v264_v63 = vld [vmem:[#allocation7 + $0x300] sm:$0xff] }
  0x56   :  { %1443 = vmatpush3.bf16.msra.mxu0 %v1442_v60  ;;  %v212_v60 = vld [vmem:[#allocation7 + $0x160] sm:$0xff] }
  0x57   :  { %1444 = vmatprep.subr.bf16.mxu0 %v1713_v0  ;;  %1425 = vmatpush3.bf16.msra.mxu1 %v1424_v7  ;;  %v1469_v3 = vpack.c.bf16 %v213_v61, %v212_v60  ;;  %v230_v7 = vld [vmem:[#allocation7 + $0x1f0] sm:$0xff] }
  0x58   :  { %1450 = vmatprep.subr.bf16.mxu1 %v1713_v0  ;;  %v1496_v12 = vpack.c.bf16 %v231_v8, %v230_v7  ;;  %v262_v61 = vld [vmem:[#allocation7 + $0x2f0] sm:$0xff]  ;;  %v1547_v7 = vpack.c.bf16 %v265_v2, %v264_v63 }
  0x5a   :  { %1446 = vmatpush3.bf16.msra.mxu0 %v1445_v4  ;;  %v214_v4 = vld [vmem:[#allocation7 + $0x170] sm:$0xff] }
  0x5b   :  { %1447 = vmatprep.subr.bf16.mxu0 %v1713_v0  ;;  %v1472_v9 = vpack.c.bf16 %v215_v5, %v214_v4  ;;  %v280_v5 = vld [vmem:[#allocation7 + $0x380] sm:$0xff] }
  0x5e   :  { %1449 = vmatpush3.bf16.msra.mxu0 %v1448_v10  ;;  %v232_v10 = vld [vmem:[#allocation7 + $0x200] sm:$0xff] }
  0x5f   :  { %1474 = vmatprep.subr.bf16.mxu0 %v1713_v0 }
 0x114   :  { %v139_v32 = vpop.f32.mrb[0].mxu0 }
 0x115   :  { %v140_v33 = vadd.f32 %v961_v31, %v139_v32  ;;  %v1115_v34 = vpop.f32.mrb[1].mxu0  ;;  %v1475_v31 = vpack.c.bf16 %v217_v25, %v216_v24  ;;  %v251_v24 = vld [vmem:[#allocation7 + $0x298] sm:$0xff] }
 0x116   :  { %v219_v34 = vld [vmem:[#allocation7 + $0x198] sm:$0xff] }
 0x117   :  { %v147_v35 = vmul.f32 1.442695, %v140_v33  ;;  %v963_v37 = vmul.f32 -1.442695, %v140_v33  ;;  %v146_v39 = vadd.f32 1.0, %v140_v33  ;;  %vm145_vm3 = vcmp.gt.f32.partialorder %v140_v33, 0.0 }
 0x118   :  { %v218_v33 = vld [vmem:[#allocation7 + $0x190] sm:$0xff] }
 0x119   :  { %1606 = vpow2.f32 %v147_v35  ;;  %v1454_v35 = vpack.c.bf16 %v203_v30, %v202_v29  ;;  %v1478_v38 = vpack.c.bf16 %v219_v34, %v218_v33  ;;  %v252_v29 = vld [vmem:[#allocation7 + $0x2a0] sm:$0xff]  ;;  %v253_v30 = vld [vmem:[#allocation7 + $0x2a8] sm:$0xff]  ;;  %v239_v33 = vld [vmem:[#allocation7 + $0x238] sm:$0xff] }
 0x11a   :  { %1608 = vpow2.f32 %v963_v37  ;;  %v205_v37 = vld [vmem:[#allocation7 + $0x128] sm:$0xff]  ;;  %v1529_v34 = vpack.c.bf16 %v253_v30, %v252_v29 }
 0x11b   :  { %v273_v29 = vld [vmem:[#allocation7 + $0x348] sm:$0xff] }
 0x123   :  { %v1607_v40 = vpop.eup %1606 }
 0x124   :  { %v149_v41 = vsel %vm145_vm3, %v146_v39, %v1607_v40  ;;  %v1609_v43 = vpop.eup %1608  ;;  %v220_v39 = vld [vmem:[#allocation7 + $0x1a0] sm:$0xff]  ;;  %v221_v40 = vld [vmem:[#allocation7 + $0x1a8] sm:$0xff] }
 0x125   :  { %v151_v42 = vsel %vm150_vm2, %v149_v41, 0.0  ;;  %v159_v44 = vadd.f32 1.0, %v1609_v43  ;;  %v1457_v41 = vpack.c.bf16 %v205_v37, %v204_v36  ;;  %v207_v43 = vld [vmem:[#allocation7 + $0x138] sm:$0xff] }
 0x126   :  { %152 = vadd.xlane.f32.xlu0 %v151_v42  ;;  %v255_v36 = vld [vmem:[#allocation7 + $0x2b8] sm:$0xff] }
 0x127   :  { %1610 = vrcp.f32 %v159_v44  ;;  %v1481_v44 = vpack.c.bf16 %v221_v40, %v220_v39  ;;  %v241_v39 = vld [vmem:[#allocation7 + $0x248] sm:$0xff] }
 0x131   :  { %v1611_v57 = vpop.eup %1610 }
 0x13c   :  { %164 = vperm.xlu0 %1605, %v1611_v57   ;;  %v226_v57 = vld [vmem:[#allocation7 + $0x1d0] sm:$0xff] }
 0x13d   :  { %v1490_v62 = vpack.c.bf16 %v227_v58, %v226_v57  ;;  %v246_v57 = vld [vmem:[#allocation7 + $0x270] sm:$0xff]  ;;  %v247_v58 = vld [vmem:[#allocation7 + $0x278] sm:$0xff] }
 0x1b3   :  { %v153_v11 = vpop.xlane.xlu0 %152 }
 0x1b4   :  { %1612 = vrcp.f32 %v153_v11  ;;  %v233_v11 = vld [vmem:[#allocation7 + $0x208] sm:$0xff] }
 0x1b5   :  { %v1499_v15 = vpack.c.bf16 %v233_v11, %v232_v10  ;;  %v267_v10 = vld [vmem:[#allocation7 + $0x318] sm:$0xff] }
 0x1bb   :  { %v165_v19 = vpop.permute.xlu0 %164 }
 0x1be   :  { %v1613_v16 = vpop.eup %1612 }
 0x1bf   :  { %v155_v18 = vmul.f32 %v1613_v16, %v151_v42  ;;  %v206_v42 = vld [vmem:[#allocation7 + $0x130] sm:$0xff] }
 0x1c0   :  { %v1460_v47 = vpack.c.bf16 %v207_v43, %v206_v42  ;;  %v257_v42 = vld [vmem:[#allocation7 + $0x2c8] sm:$0xff] }
 0x1c1   :  { %v1819_v20 = vmul.f32 %v165_v19, %v155_v18  ;;  %v234_v18 = vld [vmem:[#allocation7 + $0x210] sm:$0xff]  ;;  %v235_v19 = vld [vmem:[#allocation7 + $0x218] sm:$0xff] }
 0x1c2   :  { %v1502_v25 = vpack.c.bf16 %v235_v19, %v234_v18  ;;  %v269_v18 = vld [vmem:[#allocation7 + $0x328] sm:$0xff]  ;;  %v1574_v19 = vpack.c.bf16 %v283_v14, %v282_v13 }
 0x1c3   :  { %v304_v23 = vrot.slane %v1819_v20, %v1817_v17 }
 0x1c5   :  { %v312_v27 = vcombine.high %v304_v23, %v304_v23  ;;  %v1824_v28 = vrot.slane %v304_v23, %v1817_v17  ;;  %v250_v23 = vld [vmem:[#allocation7 + $0x290] sm:$0xff] }
 0x1c7   :  { %v1827_v32 = vrot.slane %v312_v27, %v1817_v17  ;;  %1149 = vmatmul.mubr.f32.vlgmr.msra.gmra.mrb[0].mxu1 %v1824_v28  ;;  %v342_v16 = vcombine.high %v1824_v28, %v1824_v28  ;;  %v237_v27 = vld [vmem:[#allocation7 + $0x228] sm:$0xff]  ;;  %v1526_v28 = vpack.c.bf16 %v251_v24, %v250_v23  ;;  %v270_v23 = vld [vmem:[#allocation7 + $0x330] sm:$0xff]  ;;  %v271_v24 = vld [vmem:[#allocation7 + $0x338] sm:$0xff] }
 0x1c8   :  { %1452 = vmatpush3.bf16.msra.mxu1 %v1451_v26  ;;  %1218 = vmatprep.mubr.msk.f32.mxu1 %vm1714_vm0, %v1715_v1  ;;  %v236_v26 = vld [vmem:[#allocation7 + $0x220] sm:$0xff] }
 0x1c9   :  { %1184 = vmatmul.mubr.f32.vlgmr.msra.gmra.mrb[2].mxu0 %v1827_v32  ;;  %1453 = vmatprep.subr.bf16.mxu1 %v1713_v0  ;;  %v344_v22 = vcombine.high %v1827_v32, %v1827_v32  ;;  %v238_v32 = vld [vmem:[#allocation7 + $0x230] sm:$0xff] }
 0x1ca   :  { %1476 = vmatpush3.bf16.msra.mxu0 %v1475_v31  ;;  %1253 = vmatprep.mubr.msk.f32.mxu0 %vm1714_vm0, %v1715_v1  ;;  %v1505_v31 = vpack.c.bf16 %v237_v27, %v236_v26  ;;  %v1508_v37 = vpack.c.bf16 %v239_v33, %v238_v32  ;;  %v286_v26 = vld [vmem:[#allocation7 + $0x3b0] sm:$0xff]  ;;  %v287_v27 = vld [vmem:[#allocation7 + $0x3b8] sm:$0xff]  ;;  %v289_v32 = vld [vmem:[#allocation7 + $0x3c8] sm:$0xff] }
 0x1cb   :  { %1477 = vmatprep.subr.bf16.mxu0 %v1713_v0  ;;  %v1580_v30 = vpack.c.bf16 %v287_v27, %v286_v26 }
 0x1cc   :  { %1455 = vmatpush3.bf16.msra.mxu1 %v1454_v35  ;;  %v254_v35 = vld [vmem:[#allocation7 + $0x2b0] sm:$0xff] }
 0x1cd   :  { %1456 = vmatprep.subr.bf16.mxu1 %v1713_v0  ;;  %v1532_v40 = vpack.c.bf16 %v255_v36, %v254_v35  ;;  %v275_v35 = vld [vmem:[#allocation7 + $0x358] sm:$0xff] }
 0x1ce   :  { %1479 = vmatpush3.bf16.msra.mxu0 %v1478_v38  ;;  %v240_v38 = vld [vmem:[#allocation7 + $0x240] sm:$0xff] }
 0x1cf   :  { %1480 = vmatprep.subr.bf16.mxu0 %v1713_v0  ;;  %v1511_v43 = vpack.c.bf16 %v241_v39, %v240_v38  ;;  %v291_v38 = vld [vmem:[#allocation7 + $0x3d8] sm:$0xff] }
 0x1d0   :  { %1458 = vmatpush3.bf16.msra.mxu1 %v1457_v41  ;;  %v256_v41 = vld [vmem:[#allocation7 + $0x2c0] sm:$0xff] }
 0x1d1   :  { %1459 = vmatprep.subr.bf16.mxu1 %v1713_v0  ;;  %v1535_v46 = vpack.c.bf16 %v257_v42, %v256_v41  ;;  %v277_v41 = vld [vmem:[#allocation7 + $0x368] sm:$0xff] }
 0x1d2   :  { %1482 = vmatpush3.bf16.msra.mxu0 %v1481_v44  ;;  %v242_v44 = vld [vmem:[#allocation7 + $0x250] sm:$0xff] }
 0x1d3   :  { %1483 = vmatprep.subr.bf16.mxu0 %v1713_v0  ;;  %v1514_v49 = vpack.c.bf16 %v243_v45, %v242_v44  ;;  %v293_v44 = vld [vmem:[#allocation7 + $0x3e8] sm:$0xff] }
 0x1d4   :  { %1461 = vmatpush3.bf16.msra.mxu1 %v1460_v47  ;;  %v258_v47 = vld [vmem:[#allocation7 + $0x2d0] sm:$0xff] }
 0x1d5   :  { %1462 = vmatprep.subr.bf16.mxu1 %v1713_v0  ;;  %v1538_v52 = vpack.c.bf16 %v259_v48, %v258_v47  ;;  %v279_v47 = vld [vmem:[#allocation7 + $0x378] sm:$0xff] }
 0x1d6   :  { %1485 = vmatpush3.bf16.msra.mxu0 %v1484_v50  ;;  %v244_v50 = vld [vmem:[#allocation7 + $0x260] sm:$0xff] }
 0x1d7   :  { %1486 = vmatprep.subr.bf16.mxu0 %v1713_v0 }
 0x1d8   :  { %1464 = vmatpush3.bf16.msra.mxu1 %v1463_v53  ;;  %v297_v53 = vcombine.high %v1819_v20, %v1819_v20  ;;  %v1520_v20 = vpack.c.bf16 %v247_v58, %v246_v57 }
 0x1d9   :  { %1465 = vmatprep.subr.bf16.mxu1 %v1713_v0 }
 0x1da   :  { %1488 = vmatpush3.bf16.msra.mxu0 %v1487_v56  ;;  %v1517_v56 = vpack.c.bf16 %v245_v51, %v244_v50  ;;  %v311_v60 = vrot.slane %v297_v53, %v1817_v17  ;;  %v295_v50 = vld [vmem:[#allocation7 + $0x3f8] sm:$0xff] }
 0x1db   :  { %1489 = vmatprep.subr.bf16.mxu0 %v1713_v0 }
 0x1dc   :  { %1467 = vmatpush3.bf16.msra.mxu1 %v1466_v59  ;;  %v1541_v59 = vpack.c.bf16 %v261_v55, %v260_v54  ;;  %v313_v4 = vcombine.high %v311_v60, %v311_v60  ;;  %v1877_v8 = vrot.slane %v311_v60, %v1817_v17 }
 0x1dd   :  { %1468 = vmatprep.subr.bf16.mxu1 %v1713_v0 }
 0x1de   :  { %1491 = vmatpush3.bf16.msra.mxu0 %v1490_v62  ;;  %v263_v62 = vld [vmem:[#allocation7 + $0x2f8] sm:$0xff]  ;;  %v343_v53 = vcombine.high %v1877_v8, %v1877_v8 }
 0x1df   :  { %1492 = vmatprep.subr.bf16.mxu0 %v1713_v0 }
 0x1e0   :  { %1470 = vmatpush3.bf16.msra.mxu1 %v1469_v3  ;;  %v1544_v3 = vpack.c.bf16 %v263_v62, %v262_v61 }
 0x1e1   :  { %1471 = vmatprep.subr.bf16.mxu1 %v1713_v0 }
 0x1e2   :  { %1494 = vmatpush3.bf16.msra.mxu0 %v1493_v6  ;;  %v281_v6 = vld [vmem:[#allocation7 + $0x388] sm:$0xff] }
 0x1e3   :  { %1495 = vmatprep.subr.bf16.mxu0 %v1713_v0  ;;  %v1571_v11 = vpack.c.bf16 %v281_v6, %v280_v5 }
 0x1e4   :  { %1473 = vmatpush3.bf16.msra.mxu1 %v1472_v9  ;;  %v266_v9 = vld [vmem:[#allocation7 + $0x310] sm:$0xff] }
 0x1e5   :  { %1498 = vmatprep.subr.bf16.mxu1 %v1713_v0 }
 0x1e6   :  { %1497 = vmatpush3.bf16.msra.mxu0 %v1496_v12  ;;  %v1882_v12 = vrot.slane %v313_v4, %v1817_v17  ;;  %v284_v17 = vld [vmem:[#allocation7 + $0x3a0] sm:$0xff] }
 0x1e7   :  { %1219 = vmatmul.mubr.f32.vlgmr.msra.gmra.mrb[2].mxu1 %v342_v16  ;;  %1522 = vmatprep.subr.bf16.mxu0 %v1713_v0  ;;  %v268_v16 = vld [vmem:[#allocation7 + $0x320] sm:$0xff] }
 0x1e8   :  { %1500 = vmatpush3.bf16.msra.mxu1 %v1499_v15  ;;  %1288 = vmatprep.mubr.msk.f32.mxu1 %vm1714_vm0, %v1715_v1  ;;  %v1550_v15 = vpack.c.bf16 %v267_v10, %v266_v9  ;;  %v345_v54 = vcombine.high %v1882_v12, %v1882_v12 }
 0x1e9   :  { %1254 = vmatmul.mubr.f32.vlgmr.msra.gmra.mrb[4].mxu0 %v344_v22  ;;  %1501 = vmatprep.subr.bf16.mxu1 %v1713_v0  ;;  %v1553_v22 = vpack.c.bf16 %v269_v18, %v268_v16 }
 0x1ea   :  { %1524 = vmatpush3.bf16.msra.mxu0 %v1523_v21  ;;  %1323 = vmatprep.mubr.msk.f32.mxu0 %vm1714_vm0, %v1715_v1  ;;  %v285_v21 = vld [vmem:[#allocation7 + $0x3a8] sm:$0xff] }
 0x1eb   :  { %1525 = vmatprep.subr.bf16.mxu0 %v1713_v0 }
 0x1ec   :  { %1503 = vmatpush3.bf16.msra.mxu1 %v1502_v25  ;;  %v1577_v25 = vpack.c.bf16 %v285_v21, %v284_v17 }
 0x1ed   :  { %1504 = vmatprep.subr.bf16.mxu1 %v1713_v0 }
 0x1ee   :  { %1527 = vmatpush3.bf16.msra.mxu0 %v1526_v28  ;;  %v1556_v28 = vpack.c.bf16 %v271_v24, %v270_v23 }
 0x1ef   :  { %1528 = vmatprep.subr.bf16.mxu0 %v1713_v0 }
 0x1f0   :  { %1506 = vmatpush3.bf16.msra.mxu1 %v1505_v31  ;;  %v288_v31 = vld [vmem:[#allocation7 + $0x3c0] sm:$0xff] }
 0x1f1   :  { %1507 = vmatprep.subr.bf16.mxu1 %v1713_v0  ;;  %v1583_v36 = vpack.c.bf16 %v289_v32, %v288_v31 }
 0x1f2   :  { %1530 = vmatpush3.bf16.msra.mxu0 %v1529_v34  ;;  %v274_v34 = vld [vmem:[#allocation7 + $0x350] sm:$0xff] }
 0x1f3   :  { %1531 = vmatprep.subr.bf16.mxu0 %v1713_v0  ;;  %v1562_v39 = vpack.c.bf16 %v275_v35, %v274_v34 }
 0x1f4   :  { %1509 = vmatpush3.bf16.msra.mxu1 %v1508_v37  ;;  %v290_v37 = vld [vmem:[#allocation7 + $0x3d0] sm:$0xff] }
 0x1f5   :  { %1510 = vmatprep.subr.bf16.mxu1 %v1713_v0  ;;  %v1586_v42 = vpack.c.bf16 %v291_v38, %v290_v37 }
 0x1f6   :  { %1533 = vmatpush3.bf16.msra.mxu0 %v1532_v40  ;;  %v276_v40 = vld [vmem:[#allocation7 + $0x360] sm:$0xff] }
 0x1f7   :  { %1534 = vmatprep.subr.bf16.mxu0 %v1713_v0  ;;  %v1565_v45 = vpack.c.bf16 %v277_v41, %v276_v40 }
 0x1f8   :  { %1512 = vmatpush3.bf16.msra.mxu1 %v1511_v43  ;;  %v292_v43 = vld [vmem:[#allocation7 + $0x3e0] sm:$0xff] }
 0x1f9   :  { %1513 = vmatprep.subr.bf16.mxu1 %v1713_v0  ;;  %v1589_v48 = vpack.c.bf16 %v293_v44, %v292_v43 }
 0x1fa   :  { %1536 = vmatpush3.bf16.msra.mxu0 %v1535_v46  ;;  %v278_v46 = vld [vmem:[#allocation7 + $0x370] sm:$0xff] }
 0x1fb   :  { %1537 = vmatprep.subr.bf16.mxu0 %v1713_v0  ;;  %v1568_v51 = vpack.c.bf16 %v279_v47, %v278_v46 }
 0x1fc   :  { %1515 = vmatpush3.bf16.msra.mxu1 %v1514_v49  ;;  %v294_v49 = vld [vmem:[#allocation7 + $0x3f0] sm:$0xff] }
 0x1fd   :  { %1516 = vmatprep.subr.bf16.mxu1 %v1713_v0 }
 0x1fe   :  { %1539 = vmatpush3.bf16.msra.mxu0 %v1538_v52  ;;  %v1592_v52 = vpack.c.bf16 %v295_v50, %v294_v49 }
 0x1ff   :  { %1540 = vmatprep.subr.bf16.mxu0 %v1713_v0 }
 0x200   :  { %1518 = vmatpush3.bf16.msra.mxu1 %v1517_v56 }
 0x201   :  { %1519 = vmatprep.subr.bf16.mxu1 %v1713_v0 }
 0x202   :  { %1542 = vmatpush3.bf16.msra.mxu0 %v1541_v59 }
 0x203   :  { %1543 = vmatprep.subr.bf16.mxu0 %v1713_v0 }
 0x204   :  { %1521 = vmatpush3.bf16.msra.mxu1 %v1520_v20 }
 0x205   :  { %1546 = vmatprep.subr.bf16.mxu1 %v1713_v0 }
 0x206   :  { %1545 = vmatpush3.bf16.msra.mxu0 %v1544_v3 }
 0x207   :  { %1289 = vmatmul.mubr.f32.vlgmr.msra.gmra.mrb[4].mxu1 %v1877_v8  ;;  %1570 = vmatprep.subr.bf16.mxu0 %v1713_v0 }
 0x208   :  { %1548 = vmatpush3.bf16.msra.mxu1 %v1547_v7  ;;  %1358 = vmatprep.mubr.msk.f32.mxu1 %vm1714_vm0, %v1715_v1 }
 0x209   :  { %1324 = vmatmul.mubr.f32.vlgmr.msra.gmra.mrb[6].mxu0 %v1882_v12  ;;  %1549 = vmatprep.subr.bf16.mxu1 %v1713_v0 }
 0x20a   :  { %1572 = vmatpush3.bf16.msra.mxu0 %v1571_v11  ;;  %1393 = vmatprep.mubr.msk.f32.mxu0 %vm1714_vm0, %v1715_v1  ;;  %v272_v1 = vld [vmem:[#allocation7 + $0x340] sm:$0xff] }
 0x20b   :  { %1573 = vmatprep.subr.bf16.mxu0 %v1713_v0  ;;  %v1559_v33 = vpack.c.bf16 %v273_v29, %v272_v1 }
 0x20c   :  { %1551 = vmatpush3.bf16.msra.mxu1 %v1550_v15 }
 0x20d   :  { %1552 = vmatprep.subr.bf16.mxu1 %v1713_v0 }
 0x20e   :  { %1575 = vmatpush3.bf16.msra.mxu0 %v1574_v19 }
 0x20f   :  { %1576 = vmatprep.subr.bf16.mxu0 %v1713_v0 }
 0x210   :  { %1554 = vmatpush3.bf16.msra.mxu1 %v1553_v22 }
 0x211   :  { %1555 = vmatprep.subr.bf16.mxu1 %v1713_v0 }
 0x212   :  { %1578 = vmatpush3.bf16.msra.mxu0 %v1577_v25 }
 0x213   :  { %1579 = vmatprep.subr.bf16.mxu0 %v1713_v0 }
 0x214   :  { %1557 = vmatpush3.bf16.msra.mxu1 %v1556_v28 }
 0x215   :  { %1558 = vmatprep.subr.bf16.mxu1 %v1713_v0 }
 0x216   :  { %1581 = vmatpush3.bf16.msra.mxu0 %v1580_v30 }
 0x217   :  { %1582 = vmatprep.subr.bf16.mxu0 %v1713_v0 }
 0x218   :  { %1560 = vmatpush3.bf16.msra.mxu1 %v1559_v33 }
 0x219   :  { %1561 = vmatprep.subr.bf16.mxu1 %v1713_v0 }
 0x21a   :  { %1584 = vmatpush3.bf16.msra.mxu0 %v1583_v36 }
 0x21b   :  { %1585 = vmatprep.subr.bf16.mxu0 %v1713_v0 }
 0x21c   :  { %1563 = vmatpush3.bf16.msra.mxu1 %v1562_v39 }
 0x21d   :  { %1564 = vmatprep.subr.bf16.mxu1 %v1713_v0 }
 0x21e   :  { %1587 = vmatpush3.bf16.msra.mxu0 %v1586_v42 }
 0x21f   :  { %1588 = vmatprep.subr.bf16.mxu0 %v1713_v0 }
 0x220   :  { %1566 = vmatpush3.bf16.msra.mxu1 %v1565_v45 }
 0x221   :  { %1567 = vmatprep.subr.bf16.mxu1 %v1713_v0 }
 0x222   :  { %1590 = vmatpush3.bf16.msra.mxu0 %v1589_v48 }
 0x223   :  { %1591 = vmatprep.subr.bf16.mxu0 %v1713_v0 }
 0x224   :  { %1569 = vmatpush3.bf16.msra.mxu1 %v1568_v51 }
 0x226   :  { %1593 = vmatpush3.bf16.msra.mxu0 %v1592_v52 }
 0x227   :  { %1359 = vmatmul.mubr.f32.vlgmr.msra.gmra.mrb[6].mxu1 %v343_v53 }
 0x229   :  { %1394 = vmatmul.mubr.f32.vlgmr.msra.gmra.mrb[8].mxu0 %v345_v54 }
 0x29a   :  { %v420_v55 = vpop.f32.mrb[0].mxu1 }
 0x29b   :  { %v1150_v56 = vpop.f32.mrb[1].mxu1 }
 0x29c   :  { %v490_v57 = vpop.f32.mrb[2].mxu0 }
 0x29d   :  { %v922_v58 = vrot.slane %v490_v57, 7  ;;  %v1185_v59 = vpop.f32.mrb[3].mxu0 }
 0x29f   :  { %v924_v60 = vsel %vm923_vm4, %v922_v58, %v420_v55 }
 0x2ba   :  { %v560_v61 = vpop.f32.mrb[2].mxu1 }
 0x2bb   :  { %v925_v0 = vrot.slane %v560_v61, 6  ;;  %v1220_v62 = vpop.f32.mrb[3].mxu1 }
 0x2bc   :  { %v630_v20 = vpop.f32.mrb[4].mxu0 }
 0x2bd   :  { %v927_v63 = vsel %vm926_vm5, %v925_v0, %v924_v60  ;;  %v928_v2 = vrot.slane %v630_v20, 5  ;;  %v1255_v3 = vpop.f32.mrb[5].mxu0 }
 0x2bf   :  { %v930_v4 = vsel %vm929_vm6, %v928_v2, %v927_v63 }
 0x2da   :  { %v700_v5 = vpop.f32.mrb[4].mxu1 }
 0x2db   :  { %v931_v6 = vrot.slane %v700_v5, 4  ;;  %v1290_v7 = vpop.f32.mrb[5].mxu1 }
 0x2dc   :  { %v770_v8 = vpop.f32.mrb[6].mxu0 }
 0x2dd   :  { %v933_v9 = vsel %vm932_vm7, %v931_v6, %v930_v4  ;;  %v934_v10 = vrot.slane %v770_v8, 3  ;;  %v1325_v11 = vpop.f32.mrb[7].mxu0 }
 0x2df   :  { %v936_v12 = vsel %vm935_vm8, %v934_v10, %v933_v9 }
 0x2fa   :  { %v840_v13 = vpop.f32.mrb[6].mxu1 }
 0x2fb   :  { %v937_v14 = vrot.slane %v840_v13, 2  ;;  %v1360_v15 = vpop.f32.mrb[7].mxu1 }
 0x2fc   :  { %v910_v16 = vpop.f32.mrb[8].mxu0 }
 0x2fd   :  { %v940_v18 = vrot.slane %v910_v16, 1  ;;  %v1395_v19 = vpop.f32.mrb[9].mxu0  ;;  %v939_v17 = vsel %vm938_vm9, %v937_v14, %v936_v12 }
 0x2ff   :  { %v942_v21 = vsel %vm941_vm10, %v940_v18, %v939_v17 }
 0x300   :  { %944 = vst [vmem:[#allocation8] sm:$0xff] %v942_v21 }
 0x301   :  { %1691 = shalt.err (!%p1688_p0)
}
 0x302   :  { %s1692_s30 = scalar_lea.hbm %s1924_s4, 128 }
 0x303   :  { %p1693_p1 = scmp.ne.s32.totalorder %s1924_s4, %s1692_s30  ;;  %p1696_p2 = scmp.lt.u32.totalorder %s1692_s30, %s1924_s4 }
 0x305   :  { %p1698_p3 = pnand %p1696_p2, %p1693_p1 }
 0x307   :  { %1701 = shalt.err (!%p1698_p3)
}
 0x308   :  { %954 = dma.vmem_to_hbm [thread:$0]  %s952_s26, 128, %s1924_s4, [#allocation4]  }
 0x309   :  { %1706 = dma.done.wait [#allocation4], 128  }
 0x30a   :  { %1707 = vsyncadd [#allocation4], 4294967168 }
 0x30b   :  { %958 = vsyncpa [#allocation3], 1 }
 0x30c   :  { %959 = vsyncpa [#allocation6], 1 }
 0x30d   :  { %960 = vsyncpa [#allocation4], 1 }

</bundles_post_ra>
